<compile_context>
chip_gen: v7x
topology: tpu7x:2x2x1
jax: 0.10.0
libtpu: 0.0.40
codegen_flags: <defaults>
</compile_context>

<pallas_src>
import functools

import jax
import jax.numpy as jnp
from jax.experimental import pallas as pl
from jax.experimental.pallas import tpu as pltpu


def _round_up(x, m):
    return (x + m - 1) // m * m


def _vmem_capacity_bytes():
    """Physical VMEM per TensorCore; conservative fallback if query unavailable."""
    try:
        return int(pltpu.get_tpu_info().vmem_capacity_bytes)
    except Exception:  # pragma: no cover - defensive; assume the smallest (v7x)
        return 64 * 1024 * 1024


def _choose_tiles(m_total, n_total, k, in_itemsize):
    """Pick (tm, tn, m_pad, n_pad, vmem_limit_bytes) for this generation."""
    vmem = _vmem_capacity_bytes()
    if vmem >= (96 << 20):        # v5e / v6e: 128 MiB VMEM per TC
        tm_cap, tn_cap = 512, 1024
    else:                         # v7x: 64 MiB VMEM per TC -> halve the tiles
        tm_cap, tn_cap = 256, 512

    # M tile: full (8-aligned) extent when small; MXU-friendly cap when large.
    tm = tm_cap if m_total >= tm_cap else _round_up(m_total, 8)
    # N tile: full extent when small (a full last-dim block is legal even when
    # not a multiple of 128 -> no N padding / no extra output writeback bytes);
    # 128-aligned cap when large.
    tn = tn_cap if n_total >= tn_cap else n_total

    m_pad = _round_up(m_total, tm)
    n_pad = _round_up(n_total, tn)

    # Double-buffered per-tile VMEM footprint (+ f32 output tile) with headroom.
    need = 2 * (tm * k + k * tn) * in_itemsize + 2 * tm * tn * 4
    vmem_limit = int(min(max(2 * need + (4 << 20), 32 << 20), int(0.9 * vmem)))
    return tm, tn, m_pad, n_pad, vmem_limit


def _matmul_kernel(a_ref, b_ref, o_ref):
    # a_ref: (tm, K) ps tile, b_ref: (K, tn) q^T tile, o_ref: (tm, tn).
    o_ref[...] = jnp.dot(
        a_ref[...], b_ref[...], preferred_element_type=jnp.float32
    ).astype(o_ref.dtype)


@functools.partial(
    jax.jit, static_argnames=("tm", "tn", "m_outer", "vmem_limit_bytes")
)
def _tiled_mm(a, b, *, tm, tn, m_outer, vmem_limit_bytes):
    """a: (M_pad, K), b: (K, N_pad) -> (M_pad, N_pad) f32 = a @ b, tiled over M and N."""
    M, K = a.shape
    Kb, N = b.shape
    assert K == Kb, "num_factors mismatch"
    assert M % tm == 0 and N % tn == 0, "inputs must be pre-padded to tile multiples"
    gm, gn = M // tm, N // tn

    if m_outer:
        # ps (smaller) resident along the inner N sweep; q^T streams on inner.
        grid = (gm, gn)
        a_spec = pl.BlockSpec((tm, K), lambda i, j: (i, 0))
        b_spec = pl.BlockSpec((K, tn), lambda i, j: (0, j))
        o_spec = pl.BlockSpec((tm, tn), lambda i, j: (i, j))
    else:
        # q^T (smaller) resident along the inner M sweep; ps streams on inner.
        grid = (gn, gm)
        a_spec = pl.BlockSpec((tm, K), lambda j, i: (i, 0))
        b_spec = pl.BlockSpec((K, tn), lambda j, i: (0, j))
        o_spec = pl.BlockSpec((tm, tn), lambda j, i: (i, j))

    in_itemsize = jnp.dtype(a.dtype).itemsize
    cost = pl.CostEstimate(
        flops=2 * M * N * K,
        transcendentals=0,
        bytes_accessed=(M * K + K * N) * in_itemsize + M * N * 4,
    )

    return pl.pallas_call(
        _matmul_kernel,
        out_shape=jax.ShapeDtypeStruct((M, N), jnp.float32),
        grid_spec=pltpu.PrefetchScalarGridSpec(
            num_scalar_prefetch=0,
            grid=grid,
            in_specs=[a_spec, b_spec],
            out_specs=o_spec,
        ),
        compiler_params=pltpu.CompilerParams(
            dimension_semantics=("parallel", "parallel"),
            vmem_limit_bytes=vmem_limit_bytes,
        ),
        cost_estimate=cost,
    )(a, b)


class PSharedQPallas:
    """JAX/Pallas re-implementation of pipeline.methods.mtl.MF_MTL.PSharedQ."""

    def __init__(self, tasks, ps_dim, q_dim, num_factors, *, key,
                 use_bf16_inputs=False):
        self.tasks = list(tasks)
        self.ps_dim = dict(ps_dim)
        self.q_dim = int(q_dim)
        self.num_factors = int(num_factors)

        keys = jax.random.split(key, len(self.tasks) + 1)
        # "randn"-style f32 params, matching the PyTorch module.
        self.ps = {
            k: jax.random.normal(keys[i], (ps_dim[k], num_factors), dtype=jnp.float32)
            for i, k in enumerate(self.tasks)
        }
        self.q = jax.random.normal(keys[-1], (q_dim, num_factors), dtype=jnp.float32)

        # ---- One-time parameter prep (hoisted out of the forward path). ----
        in_dtype = jnp.bfloat16 if use_bf16_inputs else jnp.float32
        in_itemsize = jnp.dtype(in_dtype).itemsize

        self._row_off = {}
        off = 0
        for k in self.tasks:
            self._row_off[k] = off
            off += ps_dim[k]
        m_total = off

        tm, tn, m_pad, n_pad, vmem_limit = _choose_tiles(
            m_total, q_dim, num_factors, in_itemsize
        )
        self._tm, self._tn = tm, tn
        self._vmem_limit = vmem_limit
        # Smaller operand on the OUTER grid axis (resident along the inner sweep).
        self._m_outer = bool(m_pad <= n_pad)

        ps_cat = jnp.concatenate([self.ps[k] for k in self.tasks], axis=0)
        if m_pad != m_total:
            ps_cat = jnp.pad(ps_cat, ((0, m_pad - m_total), (0, 0)))
        q_t = self.q.T  # (K, q_dim), pre-transposed once so the kernel is [M,K]x[K,N]
        if n_pad != q_dim:
            q_t = jnp.pad(q_t, ((0, 0), (0, n_pad - q_dim)))

        self._ps_cat = jax.device_put(ps_cat.astype(in_dtype))
        self._q_t = jax.device_put(q_t.astype(in_dtype))

    def __call__(self):
        y = _tiled_mm(
            self._ps_cat,
            self._q_t,
            tm=self._tm,
            tn=self._tn,
            m_outer=self._m_outer,
            vmem_limit_bytes=self._vmem_limit,
        )
        # Per-task views at the ORIGINAL (unpadded) offsets/extents so padding
        # rows/columns never leak into results.
        return {
            k: y[self._row_off[k]: self._row_off[k] + self.ps_dim[k], : self.q_dim]
            for k in self.tasks
        }


if __name__ == "__main__":
    tasks = ["click", "purchase"]
    ps_dim = {"click": 16, "purchase": 8}
    q_dim = 64
    num_factors = 32

    model = PSharedQPallas(
        tasks, ps_dim, q_dim, num_factors, key=jax.random.PRNGKey(0)
    )

    y_pred = model()
    for k in tasks:
        jax.block_until_ready(y_pred[k])

    # Sanity check against a plain-JAX reference (same f32-accumulating dot).
    for k in tasks:
        ref = jnp.dot(model.ps[k], model.q.T, preferred_element_type=jnp.float32)
        assert y_pred[k].shape == (ps_dim[k], q_dim)
        assert jnp.allclose(y_pred[k], ref, atol=1e-5, rtol=1e-5), f"mismatch for task {k}"

    print("KERNEL_OK")
</pallas_src>

<mosaic_0001>
module attributes {stable_mosaic.version = 11 : i64} {
  func.func @_matmul_kernel(%arg0: i32, %arg1: i32, %arg2: memref<24x32xf32, #tpu.memory_space<vmem>>, %arg3: memref<32x64xf32, #tpu.memory_space<vmem>>, %arg4: memref<24x64xf32, #tpu.memory_space<vmem>>) attributes {dimension_semantics = [#tpu.dimension_semantics<parallel>, #tpu.dimension_semantics<parallel>], iteration_bounds = array<i64: 1, 1>, scalar_prefetch = 0 : i64, scratch_operands = 0 : i64, tpu.core_type = #tpu.core_type<tc>, window_params = [{transform_indices = @transform_0, window_bounds = array<i64: 24, 32>}, {transform_indices = @transform_1, window_bounds = array<i64: 32, 64>}, {transform_indices = @transform_2, window_bounds = array<i64: 24, 64>}]} {
    %c0 = arith.constant 0 : index
    %c0_0 = arith.constant 0 : index
    %0 = vector.load %arg2[%c0, %c0_0] : memref<24x32xf32, #tpu.memory_space<vmem>>, vector<24x32xf32>
    %c0_1 = arith.constant 0 : index
    %c0_2 = arith.constant 0 : index
    %1 = vector.load %arg3[%c0_1, %c0_2] : memref<32x64xf32, #tpu.memory_space<vmem>>, vector<32x64xf32>
    %cst = arith.constant dense<0.000000e+00> : vector<24x64xf32>
    %2 = tpu.matmul %0, %1, %cst {dimension_numbers = #tpu.dot_dimension_numbers<[1], [0], [0], [1], [0, 0, 1, 1], [], []>} : vector<24x32xf32>, vector<32x64xf32>, vector<24x64xf32> -> vector<24x64xf32>
    %c0_3 = arith.constant 0 : index
    %c0_4 = arith.constant 0 : index
    %3 = vector.load %arg4[%c0_3, %c0_4] : memref<24x64xf32, #tpu.memory_space<vmem>>, vector<24x64xf32>
    tpu.vector_store %arg4[%c0_3, %c0_4], %2 {strides = array<i32>} : memref<24x64xf32, #tpu.memory_space<vmem>>, vector<24x64xf32>,
    return
  }
  func.func @transform_0(%arg0: i32, %arg1: i32) -> (i32, i32) {
    %c0_i32 = arith.constant 0 : i32
    %c0_i32_0 = arith.constant 0 : i32
    return %arg0, %c0_i32 : i32, i32
  }
  func.func @transform_1(%arg0: i32, %arg1: i32) -> (i32, i32) {
    %c0_i32 = arith.constant 0 : i32
    %c0_i32_0 = arith.constant 0 : i32
    return %c0_i32, %arg1 : i32, i32
  }
  func.func @transform_2(%arg0: i32, %arg1: i32) -> (i32, i32) {
    %c0_i32 = arith.constant 0 : i32
    return %arg0, %arg1 : i32, i32
  }
}

</mosaic_0001>

<bundles_post_ra>
// kernel: _tiled_mm.1
= control target key start
LH: loop header
LB: loop body
LE: loop exit
PB: predicated region body
PF: predicated region fallthrough
CT: control target
= control target key end

     0   :  { %7 = vsyncpa [#allocation3], 0  ;;  %s347_s0 = inlined_call_operand.hbm [shape: f32[24,32], index: 0, kind: input, shape index: {}]   ;;  %s348_s1 = inlined_call_operand.hbm [shape: f32[32,64], index: 1, kind: input, shape index: {}]   ;;  %s349_s2 = inlined_call_operand.hbm [shape: f32[24,64], index: 2, kind: output, shape index: {}]  }
   0x1   :  { %8 = vsyncpa [#allocation6], 0 }
   0x2   :  { %9 = vsyncpa [#allocation4], 0  ;;  %s276_s9 = smov [#allocation2]   ;;  %s204_s13 = scalar_lea.hbm %s347_s0, 384 }
   0x3   :  { %s15_s10 = sshll.u32 %s276_s9, 4  ;;  %p205_p0 = scmp.ne.s32.totalorder %s347_s0, %s204_s13  ;;  %s16_s10 = int_to_ptr.vmem [resolvable:$true] %s15_s10 }
   0x4   :  { %p208_p1 = scmp.lt.u32.totalorder %s204_s13, %s347_s0 }
   0x6   :  { %p210_p2 = pnand %p208_p1, %p205_p0 }
   0x8   :  { %213 = shalt.err (!%p210_p2)
}
   0x9   :  { %s214_s18 = scalar_lea.vmem %s16_s10, 384  ;;  %p219_p4 = scmp.lt.s32.totalorder %s16_s10, %s16_s10 }
   0xa   :  { %p215_p3 = scmp.ne.s32.totalorder %s16_s10, %s214_s18  ;;  %p220_p5 = scmp.lt.s32.totalorder %s214_s18, %s214_s18 }
   0xc   :  { %p221_p6 = por %p220_p5, %p219_p4 }
   0xe   :  { %p222_p7 = pnand %p221_p6, %p215_p3 }
  0x10   :  { %225 = shalt.err (!%p222_p7)
}
  0x11   :  { %s277_s19 = smov 128   ;;  %s278_s20 = smov 8  }
  0x12   :  { %21 = dma.hbm_to_vmem [thread:$0]  %s347_s0, 384, %s16_s10, [#allocation3], %s277_s19, %s277_s19, %s278_s20  }
  0x13   :  { %s279_s23 = smov [#allocation5]   ;;  %s226_s27 = scalar_lea.hbm %s348_s1, 512 }
  0x14   :  { %s27_s24 = sshll.u32 %s279_s23, 4  ;;  %p227_p8 = scmp.ne.s32.totalorder %s348_s1, %s226_s27  ;;  %s28_s24 = int_to_ptr.vmem [resolvable:$true] %s27_s24 }
  0x15   :  { %p230_p9 = scmp.lt.u32.totalorder %s226_s27, %s348_s1 }
  0x17   :  { %p232_p10 = pnand %p230_p9, %p227_p8 }
  0x19   :  { %235 = shalt.err (!%p232_p10)
}
  0x1a   :  { %s236_s4 = scalar_lea.vmem %s28_s24, 512  ;;  %p241_p12 = scmp.lt.s32.totalorder %s28_s24, %s28_s24 }
  0x1b   :  { %p237_p11 = scmp.ne.s32.totalorder %s28_s24, %s236_s4  ;;  %p242_p13 = scmp.lt.s32.totalorder %s236_s4, %s236_s4 }
  0x1d   :  { %p243_p0 = por %p242_p13, %p241_p12 }
  0x1f   :  { %p244_p1 = pnand %p243_p0, %p237_p11 }
  0x21   :  { %247 = shalt.err (!%p244_p1)
}
  0x22   :  { %33 = dma.hbm_to_vmem [thread:$0]  %s348_s1, 512, %s28_s24, [#allocation6], %s277_s19, %s277_s19, %s278_s20  }
  0x23   :  { %270 = dma.done.wait [#allocation3], 384  }
  0x24   :  { %271 = vsyncadd [#allocation3], 4294966912 }
  0x25   :  { %272 = dma.done.wait [#allocation6], 512  }
  0x26   :  { %273 = vsyncadd [#allocation6], 4294966784  ;;  %v280_v0 = vmov 0.0|0.0   ;;  %vm281_vm0 = vmmov 0   ;;  %v282_v1 = vmov 0.0   ;;  %v43_v2 = vld [vmem:[#allocation5] sm:$0xff] }
  0x27   :  { %192 = vmatprep.subr.bf16.mxu1 %v280_v0  ;;  %186 = vmatprep.subr.bf16.mxu0 %v280_v0  ;;  %v44_v3 = vld [vmem:[#allocation5 + $0x8] sm:$0xff]  ;;  %v45_v4 = vld [vmem:[#allocation5 + $0x10] sm:$0xff]  ;;  %v46_v6 = vld [vmem:[#allocation5 + $0x18] sm:$0xff]  ;;  %vm47_vm1 = vcmask 261120   ;;  %vm137_vm2 = vcmask 523264   ;;  %s283_s1 = smov [#allocation7]  }
  0x28   :  { %180 = vmatprep.mubr.msk.f32.mxu1 %vm281_vm0, %v282_v1  ;;  %177 = vmatprep.mubr.msk.f32.mxu0 %vm281_vm0, %v282_v1  ;;  %v187_v5 = vpack.c.bf16 %v44_v3, %v43_v2  ;;  %v190_v7 = vpack.c.bf16 %v46_v6, %v45_v4  ;;  %v41_v8 = vld [vmem:[#allocation2 + $0x8] sm:$0xff]  ;;  %v40_v9 = vld [vmem:[#allocation2] sm:$0xff]  ;;  %v42_v10 = vld [vmem:[#allocation2 + $0x10] sm:$0xff]  ;;  %s146_s6 = sshll.u32 %s283_s1, 4  ;;  %s147_s6 = int_to_ptr.vmem [resolvable:$true] %s146_s6 }
  0x29   :  { %s248_s7 = scalar_lea.vmem %s147_s6, 384  ;;  %p253_p3 = scmp.lt.s32.totalorder %s147_s6, %s147_s6 }
  0x2a   :  { %194 = vmatpush3.bf16.msra.mxu1 %v187_v5  ;;  %188 = vmatpush3.bf16.msra.mxu0 %v187_v5  ;;  %p249_p2 = scmp.ne.s32.totalorder %s147_s6, %s248_s7  ;;  %p254_p4 = scmp.lt.s32.totalorder %s248_s7, %s248_s7 }
  0x2b   :  { %193 = vmatprep.subr.bf16.mxu1 %v280_v0  ;;  %189 = vmatprep.subr.bf16.mxu0 %v280_v0 }
  0x2c   :  { %p255_p5 = por %p254_p4, %p253_p3 }
  0x2e   :  { %195 = vmatpush3.bf16.msra.mxu1 %v190_v7  ;;  %191 = vmatpush3.bf16.msra.mxu0 %v190_v7  ;;  %p256_p6 = pnand %p255_p5, %p249_p2 }
  0x31   :  { %181 = vmatmul.mubr.msk.f32.vlgmr.msra.gmra.mrb[0].mxu1 %vm47_vm1, %v41_v8  ;;  %178 = vmatmul.mubr.msk.f32.vlgmr.msra.gmra.mrb[0].mxu0 %vm47_vm1, %v40_v9 }
  0x32   :  { %183 = vmatprep.mubr.msk.f32.mxu1 %vm281_vm0, %v282_v1 }
  0x35   :  { %184 = vmatmul.mubr.msk.f32.gmra.mrb[2].mxu1 %vm47_vm1, %v42_v10 }
 0x104   :  { %v128_v11 = vpop.f32.mrb[0].mxu1  ;;  %v123_v12 = vpop.f32.mrb[0].mxu0 }
 0x105   :  { %139 = vst.msk [vmem:[#allocation7 + $0x8] sm:$0xff] %vm137_vm2, %v128_v11  ;;  %v182_v13 = vpop.f32.mrb[1].mxu1  ;;  %138 = vst.msk [vmem:[#allocation7] sm:$0xff] %vm137_vm2, %v123_v12  ;;  %v179_v14 = vpop.f32.mrb[1].mxu0 }
 0x108   :  { %v133_v15 = vpop.f32.mrb[2].mxu1 }
 0x109   :  { %140 = vst.msk [vmem:[#allocation7 + $0x10] sm:$0xff] %vm137_vm2, %v133_v15  ;;  %v185_v16 = vpop.f32.mrb[3].mxu1 }
 0x10a   :  { %259 = shalt.err (!%p256_p6)
}
 0x10b   :  { %s260_s10 = scalar_lea.hbm %s349_s2, 384 }
 0x10c   :  { %p261_p7 = scmp.ne.s32.totalorder %s349_s2, %s260_s10  ;;  %p264_p8 = scmp.lt.u32.totalorder %s260_s10, %s349_s2 }
 0x10e   :  { %p266_p9 = pnand %p264_p8, %p261_p7 }
 0x110   :  { %269 = shalt.err (!%p266_p9)
}
 0x111   :  { %152 = dma.vmem_to_hbm [thread:$0]  %s147_s6, 384, %s349_s2, [#allocation4], %s277_s19, %s277_s19, %s278_s20  }
 0x112   :  { %274 = dma.done.wait [#allocation4], 384  }
 0x113   :  { %275 = vsyncadd [#allocation4], 4294966912 }
 0x114   :  { %156 = vsyncpa [#allocation3], 1 }
 0x115   :  { %157 = vsyncpa [#allocation6], 1 }
 0x116   :  { %158 = vsyncpa [#allocation4], 1 }

</bundles_post_ra>
